<compile_context>
chip_gen: v7x
topology: tpu7x:2x2x1
jax: 0.10.0
libtpu: 0.0.40
codegen_flags: <defaults>
</compile_context>

<pallas_src>
import functools

import jax
import jax.numpy as jnp
from jax import lax
from jax.experimental import pallas as pl
from jax.experimental.pallas import tpu as pltpu


def _lora_linear_kernel(x_ref, w_ref, a_ref, b_ref, o_ref, acc_ref, xa_ref,
                        *, scale):
    # x_ref: (tm, tk)       bf16
    # w_ref: (tn, tk)       bf16   (stored [out, in] layout, tiled)
    # a_ref: (tk, r_pad)    bf16
    # b_ref: (r_pad, tn)    bf16
    # o_ref: (tm, tn)       bf16
    # acc_ref: (tm, tn)     f32  scratch accumulator (base GEMM)
    # xa_ref:  (tm, r_pad)  f32  scratch accumulator (x @ lora_A)
    k = pl.program_id(2)
    nk = pl.num_programs(2)

    @pl.when(k == 0)
    def _():
        acc_ref[...] = jnp.zeros_like(acc_ref)
        xa_ref[...] = jnp.zeros_like(xa_ref)

    x = x_ref[...]

    # Base path: contract x (tm, tk) with W-tile (tn, tk) over the K axis.
    # No transpose — dot_general feeds the MXU with W in its stored layout.
    acc_ref[...] += lax.dot_general(
        x, w_ref[...],
        dimension_numbers=(((1,), (1,)), ((), ())),
        preferred_element_type=jnp.float32)

    # LoRA path, first stage: accumulate x @ A over K.
    xa_ref[...] += jnp.dot(x, a_ref[...], preferred_element_type=jnp.float32)

    @pl.when(k == nk - 1)
    def _():
        # Second LoRA stage: (x @ A) rounded to bf16 once (PyTorch semantics),
        # then @ B on the MXU with f32 accumulation.
        lora = jnp.dot(xa_ref[...].astype(jnp.bfloat16), b_ref[...],
                       preferred_element_type=jnp.float32)
        o_ref[...] = (acc_ref[...] + scale * lora).astype(o_ref.dtype)


def _pick_tile(dim, target, align):
    """Largest multiple of `align` <= target that divides dim, else full dim."""
    if dim <= target:
        return dim
    t = (target // align) * align
    while t >= align:
        if dim % t == 0:
            return t
        t -= align
    return dim  # fall back to the full (untiled) dimension


def lora_linear(x, weight, lora_a, lora_b, *, scale=2.0,
                tm_target=256, tn_target=256, tk_target=2048):
    """x: [M, in_features]; weight: [out, in]; returns [M, out_features]."""
    M, K = x.shape
    N, K_w = weight.shape
    assert K == K_w
    r = lora_a.shape[1]
    assert lora_a.shape == (K, r)
    assert lora_b.shape == (r, N)

    # Pad the LoRA rank to a multiple of 128 once (lane-dense MXU tiles).
    # Zero padding preserves exact results.
    r_pad = ((r + 127) // 128) * 128
    if r_pad != r:
        lora_a = jnp.pad(lora_a, ((0, 0), (0, r_pad - r)))
        lora_b = jnp.pad(lora_b, ((0, r_pad - r), (0, 0)))

    tm = _pick_tile(M, tm_target, 16)    # bf16 sublane packing
    tn = _pick_tile(N, tn_target, 128)   # lane-dense output stores
    tk = _pick_tile(K, tk_target, 128)

    grid = (M // tm, N // tn, K // tk)

    kernel = functools.partial(_lora_linear_kernel, scale=scale)

    # Rough VMEM budget (bytes): double-buffered bf16 tiles + f32 scratch.
    itemsize = jnp.dtype(x.dtype).itemsize
    est = (2 * itemsize * (tm * tk + tn * tk + tk * r_pad + r_pad * tn + tm * tn)
           + 4 * (tm * tn + tm * r_pad))
    cp_kwargs = dict(dimension_semantics=("parallel", "parallel", "arbitrary"))
    if est > 24 * 1024 * 1024:
        # Raise the scoped-VMEM limit but stay under v7x's 64 MiB physical cap.
        cp_kwargs["vmem_limit_bytes"] = min(int(est * 1.5), 56 * 1024 * 1024)

    return pl.pallas_call(
        kernel,
        out_shape=jax.ShapeDtypeStruct((M, N), x.dtype),
        grid_spec=pltpu.PrefetchScalarGridSpec(
            num_scalar_prefetch=0,
            grid=grid,
            in_specs=[
                pl.BlockSpec((tm, tk), lambda i, j, k: (i, k)),      # x tile
                pl.BlockSpec((tn, tk), lambda i, j, k: (j, k)),      # W tile (stored layout)
                pl.BlockSpec((tk, r_pad), lambda i, j, k: (k, 0)),   # lora_A tile
                pl.BlockSpec((r_pad, tn), lambda i, j, k: (0, j)),   # lora_B tile
            ],
            out_specs=pl.BlockSpec((tm, tn), lambda i, j, k: (i, j)),
            scratch_shapes=[
                pltpu.VMEM((tm, tn), jnp.float32),     # base accumulator
                pltpu.VMEM((tm, r_pad), jnp.float32),  # x @ A accumulator
            ],
        ),
        compiler_params=pltpu.CompilerParams(**cp_kwargs),
    )(x, weight, lora_a, lora_b)


def lora_linear_ref(x, weight, lora_a, lora_b, scale=2.0):
    base = jnp.dot(x.astype(jnp.float32), weight.astype(jnp.float32).T)
    xa = jnp.dot(x.astype(jnp.float32),
                 lora_a.astype(jnp.float32)).astype(jnp.bfloat16)
    lora = jnp.dot(xa.astype(jnp.float32), lora_b.astype(jnp.float32))
    return (base + scale * lora).astype(x.dtype)


if __name__ == "__main__":
    # Small shapes consistent with the module: batch=2, seq=8 -> M=16 rows,
    # in_features=32, out_features=32, r=16.
    batch, seq = 2, 8
    in_features, out_features, r = 32, 32, 16
    M = batch * seq

    key = jax.random.PRNGKey(0)
    kx, kw, ka, kb = jax.random.split(key, 4)

    # Deterministic synthetic parameters (module init zeroes lora_B; we use
    # small random values so the LoRA path is actually exercised).
    x = jax.random.normal(kx, (batch, seq, in_features),
                          dtype=jnp.float32).astype(jnp.bfloat16)
    weight = (jax.random.normal(kw, (out_features, in_features),
                                dtype=jnp.float32) * 0.05).astype(jnp.bfloat16)
    lora_a = (jax.random.normal(ka, (in_features, r),
                                dtype=jnp.float32) * 0.05).astype(jnp.bfloat16)
    lora_b = (jax.random.normal(kb, (r, out_features),
                                dtype=jnp.float32) * 0.05).astype(jnp.bfloat16)

    x2d = x.reshape(M, in_features)  # glue reshape outside the kernel

    out = lora_linear(x2d, weight, lora_a, lora_b, scale=2.0)
    out = jax.block_until_ready(out).reshape(batch, seq, out_features)

    ref = lora_linear_ref(x2d, weight, lora_a, lora_b,
                          scale=2.0).reshape(batch, seq, out_features)

    err = jnp.max(jnp.abs(out.astype(jnp.float32) - ref.astype(jnp.float32)))
    assert float(err) < 5e-2, f"mismatch vs reference: {err}"

    print("KERNEL_OK")
</pallas_src>

<mosaic_0001>
module attributes {stable_mosaic.version = 11 : i64} {
  func.func @_lora_linear_kernel(%arg0: i32, %arg1: i32, %arg2: i32, %arg3: memref<16x32xbf16, #tpu.memory_space<vmem>>, %arg4: memref<32x32xbf16, #tpu.memory_space<vmem>>, %arg5: memref<32x128xbf16, #tpu.memory_space<vmem>>, %arg6: memref<128x32xbf16, #tpu.memory_space<vmem>>, %arg7: memref<16x32xbf16, #tpu.memory_space<vmem>>, %arg8: memref<16x32xf32, #tpu.memory_space<vmem>>, %arg9: memref<16x128xf32, #tpu.memory_space<vmem>>) attributes {dimension_semantics = [#tpu.dimension_semantics<parallel>, #tpu.dimension_semantics<parallel>, #tpu.dimension_semantics<arbitrary>], iteration_bounds = array<i64: 1, 1, 1>, scalar_prefetch = 0 : i64, scratch_operands = 2 : i64, tpu.core_type = #tpu.core_type<tc>, window_params = [{transform_indices = @transform_0, window_bounds = array<i64: 16, 32>}, {transform_indices = @transform_1, window_bounds = array<i64: 32, 32>}, {transform_indices = @transform_2, window_bounds = array<i64: 32, 128>}, {transform_indices = @transform_3, window_bounds = array<i64: 128, 32>}, {transform_indices = @transform_4, window_bounds = array<i64: 16, 32>}]} {
    %c0_i32 = arith.constant 0 : i32
    %0 = arith.cmpi eq, %arg2, %c0_i32 : i32
    %1 = arith.extui %0 : i1 to i32
    %c0_i32_0 = arith.constant 0 : i32
    %2 = arith.cmpi ne, %1, %c0_i32_0 : i32
    scf.if %2 {
      %cst_17 = arith.constant 0.000000e+00 : f32
      %17 = vector.broadcast %cst_17 : f32 to vector<16x32xf32>
      %c0_18 = arith.constant 0 : index
      %c0_19 = arith.constant 0 : index
      %18 = vector.load %arg8[%c0_18, %c0_19] : memref<16x32xf32, #tpu.memory_space<vmem>>, vector<16x32xf32>
      tpu.vector_store %arg8[%c0_18, %c0_19], %17 {strides = array<i32>} : memref<16x32xf32, #tpu.memory_space<vmem>>, vector<16x32xf32>,
      %cst_20 = arith.constant 0.000000e+00 : f32
      %19 = vector.broadcast %cst_20 : f32 to vector<16x128xf32>
      %c0_21 = arith.constant 0 : index
      %c0_22 = arith.constant 0 : index
      %20 = vector.load %arg9[%c0_21, %c0_22] : memref<16x128xf32, #tpu.memory_space<vmem>>, vector<16x128xf32>
      tpu.vector_store %arg9[%c0_21, %c0_22], %19 {strides = array<i32>} : memref<16x128xf32, #tpu.memory_space<vmem>>, vector<16x128xf32>,
    } else {
    }
    %c0 = arith.constant 0 : index
    %c0_1 = arith.constant 0 : index
    %3 = vector.load %arg3[%c0, %c0_1] : memref<16x32xbf16, #tpu.memory_space<vmem>>, vector<16x32xbf16>
    %c0_2 = arith.constant 0 : index
    %c0_3 = arith.constant 0 : index
    %4 = vector.load %arg8[%c0_2, %c0_3] : memref<16x32xf32, #tpu.memory_space<vmem>>, vector<16x32xf32>
    %c0_4 = arith.constant 0 : index
    %c0_5 = arith.constant 0 : index
    %5 = vector.load %arg4[%c0_4, %c0_5] : memref<32x32xbf16, #tpu.memory_space<vmem>>, vector<32x32xbf16>
    %cst = arith.constant dense<0.000000e+00> : vector<16x32xf32>
    %6 = tpu.matmul %3, %5, %cst {dimension_numbers = #tpu.dot_dimension_numbers<[1], [1], [0], [0], [0, 0, 1, 0], [], []>} : vector<16x32xbf16>, vector<32x32xbf16>, vector<16x32xf32> -> vector<16x32xf32>
    %7 = arith.addf %4, %6 : vector<16x32xf32>
    %c0_6 = arith.constant 0 : index
    %c0_7 = arith.constant 0 : index
    %8 = vector.load %arg8[%c0_6, %c0_7] : memref<16x32xf32, #tpu.memory_space<vmem>>, vector<16x32xf32>
    tpu.vector_store %arg8[%c0_6, %c0_7], %7 {strides = array<i32>} : memref<16x32xf32, #tpu.memory_space<vmem>>, vector<16x32xf32>,
    %c0_8 = arith.constant 0 : index
    %c0_9 = arith.constant 0 : index
    %9 = vector.load %arg9[%c0_8, %c0_9] : memref<16x128xf32, #tpu.memory_space<vmem>>, vector<16x128xf32>
    %c0_10 = arith.constant 0 : index
    %c0_11 = arith.constant 0 : index
    %10 = vector.load %arg5[%c0_10, %c0_11] : memref<32x128xbf16, #tpu.memory_space<vmem>>, vector<32x128xbf16>
    %cst_12 = arith.constant dense<0.000000e+00> : vector<16x128xf32>
    %11 = tpu.matmul %3, %10, %cst_12 {dimension_numbers = #tpu.dot_dimension_numbers<[1], [0], [0], [1], [0, 0, 1, 1], [], []>} : vector<16x32xbf16>, vector<32x128xbf16>, vector<16x128xf32> -> vector<16x128xf32>
    %12 = arith.addf %9, %11 : vector<16x128xf32>
    %c0_13 = arith.constant 0 : index
    %c0_14 = arith.constant 0 : index
    %13 = vector.load %arg9[%c0_13, %c0_14] : memref<16x128xf32, #tpu.memory_space<vmem>>, vector<16x128xf32>
    tpu.vector_store %arg9[%c0_13, %c0_14], %12 {strides = array<i32>} : memref<16x128xf32, #tpu.memory_space<vmem>>, vector<16x128xf32>,
    %c0_i32_15 = arith.constant 0 : i32
    %14 = arith.cmpi eq, %arg2, %c0_i32_15 : i32
    %15 = arith.extui %14 : i1 to i32
    %c0_i32_16 = arith.constant 0 : i32
    %16 = arith.cmpi ne, %15, %c0_i32_16 : i32
    scf.if %16 {
      %c0_17 = arith.constant 0 : index
      %c0_18 = arith.constant 0 : index
      %17 = vector.load %arg9[%c0_17, %c0_18] : memref<16x128xf32, #tpu.memory_space<vmem>>, vector<16x128xf32>
      %18 = arith.truncf %17 : vector<16x128xf32> to vector<16x128xbf16>
      %c0_19 = arith.constant 0 : index
      %c0_20 = arith.constant 0 : index
      %19 = vector.load %arg6[%c0_19, %c0_20] : memref<128x32xbf16, #tpu.memory_space<vmem>>, vector<128x32xbf16>
      %cst_21 = arith.constant dense<0.000000e+00> : vector<16x32xf32>
      %20 = tpu.matmul %18, %19, %cst_21 {dimension_numbers = #tpu.dot_dimension_numbers<[1], [0], [0], [1], [0, 0, 1, 1], [], []>} : vector<16x128xbf16>, vector<128x32xbf16>, vector<16x32xf32> -> vector<16x32xf32>
      %c0_22 = arith.constant 0 : index
      %c0_23 = arith.constant 0 : index
      %21 = vector.load %arg8[%c0_22, %c0_23] : memref<16x32xf32, #tpu.memory_space<vmem>>, vector<16x32xf32>
      %cst_24 = arith.constant 2.000000e+00 : f32
      %22 = vector.broadcast %cst_24 : f32 to vector<16x32xf32>
      %23 = arith.mulf %22, %20 : vector<16x32xf32>
      %24 = arith.addf %21, %23 : vector<16x32xf32>
      %25 = arith.truncf %24 : vector<16x32xf32> to vector<16x32xbf16>
      %c0_25 = arith.constant 0 : index
      %c0_26 = arith.constant 0 : index
      %26 = vector.load %arg7[%c0_25, %c0_26] : memref<16x32xbf16, #tpu.memory_space<vmem>>, vector<16x32xbf16>
      tpu.vector_store %arg7[%c0_25, %c0_26], %25 {strides = array<i32>} : memref<16x32xbf16, #tpu.memory_space<vmem>>, vector<16x32xbf16>,
    } else {
    }
    return
  }
  func.func @transform_0(%arg0: i32, %arg1: i32, %arg2: i32) -> (i32, i32) {
    %c0_i32 = arith.constant 0 : i32
    return %arg0, %arg2 : i32, i32
  }
  func.func @transform_1(%arg0: i32, %arg1: i32, %arg2: i32) -> (i32, i32) {
    %c0_i32 = arith.constant 0 : i32
    return %arg1, %arg2 : i32, i32
  }
  func.func @transform_2(%arg0: i32, %arg1: i32, %arg2: i32) -> (i32, i32) {
    %c0_i32 = arith.constant 0 : i32
    %c0_i32_0 = arith.constant 0 : i32
    return %arg2, %c0_i32 : i32, i32
  }
  func.func @transform_3(%arg0: i32, %arg1: i32, %arg2: i32) -> (i32, i32) {
    %c0_i32 = arith.constant 0 : i32
    %c0_i32_0 = arith.constant 0 : i32
    return %c0_i32, %arg1 : i32, i32
  }
  func.func @transform_4(%arg0: i32, %arg1: i32, %arg2: i32) -> (i32, i32) {
    %c0_i32 = arith.constant 0 : i32
    return %arg0, %arg1 : i32, i32
  }
}

</mosaic_0001>

<bundles_post_ra>
// kernel: tpu_custom_call.1
= control target key start
LH: loop header
LB: loop body
LE: loop exit
PB: predicated region body
PF: predicated region fallthrough
CT: control target
= control target key end

     0   :  { %vm23_vm0 = vcmask 261120   ;;  %v425_v0 = vmov 0.0   ;;  %vm426_vm1 = vmmov 0   ;;  %s517_s0 = inlined_call_operand.vmem [shape: bf16[16,32], index: 0, kind: input, shape index: {}]   ;;  %s518_s1 = inlined_call_operand.vmem [shape: bf16[32,32], index: 1, kind: input, shape index: {}]   ;;  %s519_s2 = inlined_call_operand.vmem [shape: bf16[32,128], index: 2, kind: input, shape index: {}]   ;;  %s520_s3 = inlined_call_operand.vmem [shape: bf16[128,32], index: 3, kind: input, shape index: {}]   ;;  %s521_s4 = inlined_call_operand.hbm [shape: bf16[16,32], index: 4, kind: output, shape index: {}]  }
   0x1   :  { %347 = vmatprep.subr.bf16.mxu0 %v425_v0  ;;  %v388_v1 = vld [vmem:[%s518_s1] sm:$0xff]   ;;  %24 = vst.msk [vmem:[#allocation2] sm:$0xff] %vm23_vm0, %v425_v0  ;;  %25 = vst.msk [vmem:[#allocation2 + $0x8] sm:$0xff] %vm23_vm0, %v425_v0  ;;  %363 = vmatprep.subr.bf16.mxu1 %v425_v0  ;;  %v389_v3 = vld [vmem:[%s518_s1 + $0x8] sm:$0xff]  }
   0x2   :  { %351 = vmatprep.mubr.msk.bf16.mxu0 %vm426_vm1, %v425_v0  ;;  %379 = vmatprep.mubr.msk.bf16.mxu1 %vm426_vm1, %v425_v0  ;;  %v56_v2 = vsel %vm23_vm0, %v388_v1, 0  ;;  %v393_v4 = vld [vmem:[%s520_s3] sm:$0xff]   ;;  %v394_v5 = vld [vmem:[%s520_s3 + $0x8] sm:$0xff]   ;;  %v59_v6 = vsel %vm23_vm0, %v389_v3, 0  ;;  %v395_v7 = vld [vmem:[%s520_s3 + $0x10] sm:$0xff]  }
   0x3   :  { %348 = vmatpush3.bf16.xpose.msra.mxu0 %v56_v2  ;;  %364 = vmatpush3.bf16.msra.mxu1 %v393_v4 }
   0x4   :  { %349 = vmatprep.subr.bf16.mxu0 %v425_v0  ;;  %365 = vmatprep.subr.bf16.mxu1 %v425_v0 }
   0x7   :  { %366 = vmatpush3.bf16.msra.mxu1 %v394_v5 }
   0xb   :  { %350 = vmatpush3.bf16.xpose.msra.mxu0 %v59_v6 }
   0xc   :  { %9 = vsyncpa [#allocation5], 0  ;;  %355 = vmatprep.subr.bf16.mxu0 %v425_v0  ;;  %367 = vmatprep.subr.bf16.mxu1 %v425_v0  ;;  %v390_v8 = vld [vmem:[%s517_s0] sm:$0xff]   ;;  %v396_v10 = vld [vmem:[%s520_s3 + $0x18] sm:$0xff]   ;;  %vm294_vm2 = vcmask 257024  }
   0xd   :  { %v391_v9 = vld [vmem:[%s519_s2] sm:$0xff]   ;;  %368 = vmatpush3.bf16.msra.mxu1 %v395_v7  ;;  %v392_v11 = vld [vmem:[%s519_s2 + $0x8] sm:$0xff]   ;;  %v399_v14 = vld [vmem:[%s520_s3 + $0x30] sm:$0xff]  }
   0xe   :  { %369 = vmatprep.subr.bf16.mxu1 %v425_v0  ;;  %v397_v12 = vld [vmem:[%s520_s3 + $0x20] sm:$0xff]   ;;  %v398_v13 = vld [vmem:[%s520_s3 + $0x28] sm:$0xff]   ;;  %v400_v15 = vld [vmem:[%s520_s3 + $0x38] sm:$0xff]   ;;  %s427_s3 = smov [#allocation4]  }
   0xf   :  { %v30_v16 = vld [vmem:[#allocation2] sm:$0xff]  ;;  %v31_v18 = vld [vmem:[#allocation2 + $0x8] sm:$0xff]  ;;  %s302_s12 = sshll.u32 %s427_s3, 4  ;;  %s303_s12 = int_to_ptr.vmem [resolvable:$true] %s302_s12 }
  0x10   :  { %s401_s13 = scalar_lea.vmem %s303_s12, 128  ;;  %p406_p1 = scmp.lt.s32.totalorder %s303_s12, %s303_s12 }
  0x11   :  { %370 = vmatpush3.bf16.msra.mxu1 %v396_v10  ;;  %p402_p0 = scmp.ne.s32.totalorder %s303_s12, %s401_s13  ;;  %p407_p2 = scmp.lt.s32.totalorder %s401_s13, %s401_s13 }
  0x12   :  { %352 = vmatmul.mubr.msk.bf16.vlgmr.msra.gmra.mrb[0].mxu0 %vm23_vm0, %v390_v8  ;;  %371 = vmatprep.subr.bf16.mxu1 %v425_v0 }
  0x13   :  { %356 = vmatpush3.bf16.msra.mxu0 %v391_v9  ;;  %359 = vmatprep.mubr.msk.bf16.mxu0 %vm426_vm1, %v425_v0  ;;  %p408_p3 = por %p407_p2, %p406_p1 }
  0x14   :  { %357 = vmatprep.subr.bf16.mxu0 %v425_v0 }
  0x15   :  { %372 = vmatpush3.bf16.msra.mxu1 %v397_v12  ;;  %p409_p4 = pnand %p408_p3, %p402_p0 }
  0x16   :  { %373 = vmatprep.subr.bf16.mxu1 %v425_v0 }
  0x17   :  { %358 = vmatpush3.bf16.msra.mxu0 %v392_v11 }
  0x19   :  { %374 = vmatpush3.bf16.msra.mxu1 %v398_v13 }
  0x1a   :  { %360 = vmatmul.mubr.msk.bf16.vlgmr.msra.gmra.mrb[4].mxu0 %vm23_vm0, %v390_v8  ;;  %375 = vmatprep.subr.bf16.mxu1 %v425_v0 }
  0x1d   :  { %376 = vmatpush3.bf16.msra.mxu1 %v399_v14 }
  0x1e   :  { %377 = vmatprep.subr.bf16.mxu1 %v425_v0 }
  0x21   :  { %378 = vmatpush3.bf16.msra.mxu1 %v400_v15 }
  0xe5   :  { %v95_v17 = vpop.f32.mrb[0].mxu0 }
  0xe6   :  { %v102_v19 = vadd.f32 %v95_v17, %v30_v16  ;;  %v353_v20 = vpop.f32.mrb[1].mxu0 }
  0xe7   :  { %v98_v21 = vpop.f32.mrb[2].mxu0 }
  0xe8   :  { %104 = vst.msk [vmem:[#allocation2] sm:$0xff] %vm23_vm0, %v102_v19  ;;  %v103_v22 = vadd.f32 %v98_v21, %v31_v18  ;;  %v354_v23 = vpop.f32.mrb[3].mxu0 }
  0xea   :  { %105 = vst.msk [vmem:[#allocation2 + $0x8] sm:$0xff] %vm23_vm0, %v103_v22 }
  0xed   :  { %v158_v24 = vpop.f32.mrb[4].mxu0 }
  0xee   :  { %v361_v25 = vpop.f32.mrb[5].mxu0 }
  0xef   :  { %v161_v26 = vpop.f32.mrb[6].mxu0  ;;  %v280_v32 = vld [vmem:[#allocation2] sm:$0xff] }
  0xf0   :  { %v174_v27 = vpack.c.bf16 %v161_v26, %v158_v24  ;;  %v362_v28 = vpop.f32.mrb[7].mxu0 }
  0xf1   :  { %v281_v37 = vld [vmem:[#allocation2 + $0x8] sm:$0xff] }
  0xf2   :  { %380 = vmatmul.mubr.bf16.vlgmr.msra.gmra.mrb[0].mxu1 %v174_v27 }
 0x1c5   :  { %v273_v29 = vpop.f32.mrb[0].mxu1 }
 0x1c6   :  { %v282_v30 = vmul.f32 2.0, %v273_v29  ;;  %v381_v31 = vpop.f32.mrb[1].mxu1 }
 0x1c7   :  { %v276_v33 = vpop.f32.mrb[2].mxu1 }
 0x1c8   :  { %v284_v34 = vadd.f32 %v282_v30, %v280_v32  ;;  %v283_v35 = vmul.f32 2.0, %v276_v33  ;;  %v382_v36 = vpop.f32.mrb[3].mxu1 }
 0x1ca   :  { %v330_v38 = vpack.c.bf16 %v284_v34, %v284_v34  ;;  %v285_v39 = vadd.f32 %v283_v35, %v281_v37 }
 0x1cc   :  { %295 = vst.msk [vmem:[#allocation4] sm:$0xf] %vm294_vm2, %v330_v38  ;;  %v331_v40 = vpack.c.bf16 %v285_v39, %v285_v39 }
 0x1ce   :  { %296 = vst.msk [vmem:[#allocation4 + $0x4] sm:$0xf] %vm294_vm2, %v331_v40 }
 0x1cf   :  { %412 = shalt.err (!%p409_p4)
}
 0x1d0   :  { %s413_s16 = scalar_lea.hbm %s521_s4, 128 }
 0x1d1   :  { %p414_p5 = scmp.ne.s32.totalorder %s521_s4, %s413_s16  ;;  %p417_p6 = scmp.lt.u32.totalorder %s413_s16, %s521_s4 }
 0x1d3   :  { %p419_p7 = pnand %p417_p6, %p414_p5 }
 0x1d5   :  { %422 = shalt.err (!%p419_p7)
}
 0x1d6   :  { %s428_s21 = smov 64   ;;  %s429_s22 = smov 4  }
 0x1d7   :  { %308 = dma.vmem_to_hbm [thread:$0]  %s303_s12, 128, %s521_s4, [#allocation5], %s428_s21, %s428_s21, %s429_s22  }
 0x1d8   :  { %423 = dma.done.wait [#allocation5], 128  }
 0x1d9   :  { %424 = vsyncadd [#allocation5], 4294967168 }
 0x1da   :  { %312 = vsyncpa [#allocation5], 1 }

</bundles_post_ra>
